<compile_context>
chip_gen: v6e
topology: v6e:2x2x1
jax: 0.10.0
libtpu: 0.0.40
codegen_flags: <defaults>
</compile_context>

<pallas_src>
import jax
import jax.numpy as jnp
from jax.experimental import pallas as pl
from jax.experimental.pallas import tpu as pltpu


def lstm_mlp_kernel(x_ref, wih_ref, whh_ref, b_ref, w1_ref, b1_ref,
                    w2_hbm_ref, b2_ref, out_ref, w2_vmem, w2_sem):
    # Kick off the big fc2-weight DMA first; it overlaps the whole recurrent loop.
    w2_copy = pltpu.make_async_copy(w2_hbm_ref, w2_vmem, w2_sem)
    w2_copy.start()

    T, E = x_ref.shape
    H = whh_ref.shape[0]

    # Hoisted input projection: one well-shaped (T,E)@(E,4H) MXU pass + bias add,
    # removed from the serial per-timestep dependency chain.
    gates_x = (jnp.dot(x_ref[...], wih_ref[...], preferred_element_type=jnp.float32)
               + b_ref[...])                                       # (T, 4H)

    whh = whh_ref[...]                                             # (H, 4H), 4 vregs
    h = jnp.zeros((1, H), jnp.float32)
    c = jnp.zeros((1, H), jnp.float32)

    # Fully unrolled time loop (T is a compile-time Python int): static slices, and the
    # scheduler can overlap adjacent iterations around the true h/c dependency.
    for t in range(T):
        gates = gates_x[t:t + 1, :] + jnp.dot(h, whh,
                                              preferred_element_type=jnp.float32)  # (1, 4H)
        # Full-width transcendentals (2 EUP ops instead of 4 narrow 32-lane ones).
        sig_all = jax.nn.sigmoid(gates)
        tanh_all = jnp.tanh(gates)
        i_g = sig_all[:, 0 * H:1 * H]
        f_g = sig_all[:, 1 * H:2 * H]
        g_g = tanh_all[:, 2 * H:3 * H]
        o_g = sig_all[:, 3 * H:4 * H]
        c = f_g * c + i_g * g_g
        h = o_g * jnp.tanh(c)

    # noise_epsilon == 0.0 -> the additive clamped-noise term is exactly zero.
    # TODO(synk): for noise_epsilon != 0 sample with pltpu.prng_seed/stateful_normal here.

    # fc1 is zero-padded to a 128-lane-dense output width; padded lanes stay exactly 0
    # through the ReLU and contribute 0 via fc2's zero-padded K rows.
    hid = jnp.dot(h, w1_ref[...], preferred_element_type=jnp.float32) + b1_ref[...]
    hid = jnp.maximum(hid, 0.0)            # relu(fc1); dropout(p=0.0) is identity

    # Only now do we need the fc2 weights; the 256 KB copy has been in flight all along.
    w2_copy.wait()
    out_ref[...] = (jnp.dot(hid, w2_vmem[...], preferred_element_type=jnp.float32)
                    + b2_ref[...])         # fc2 -> (B, 512)


def module5_forward(x, p):
    B, T, E = x.shape
    H = p["w_hh_t"].shape[0]
    assert B == 1, "Module_5 requires batch == 1 (asserts output shape (1, 512))"
    assert E == H, "Module_5 requires embedding_dim == hidden_size (h0/c0 use x.size(2))"
    x2d = x.reshape(T, E)                  # B == 1: pure view, no transpose/copy
    Hp, N2 = p["w_fc2_t_pad"].shape        # (128-lane-padded K, 512)

    vmem = pl.BlockSpec(memory_space=pltpu.MemorySpace.VMEM)
    return pl.pallas_call(
        lstm_mlp_kernel,
        out_shape=jax.ShapeDtypeStruct((B, 512), jnp.float32),
        in_specs=[vmem, vmem, vmem, vmem, vmem, vmem,
                  pl.BlockSpec(memory_space=pl.ANY),   # w_fc2_t_pad stays in HBM
                  vmem],
        out_specs=pl.BlockSpec(memory_space=pltpu.MemorySpace.VMEM),
        scratch_shapes=[pltpu.VMEM((Hp, N2), jnp.float32),
                        pltpu.SemaphoreType.DMA(())],
    )(x2d, p["w_ih_t"], p["w_hh_t"], p["b_gates"],
      p["w_fc1_t_pad"], p["b_fc1_pad"], p["w_fc2_t_pad"], p["b_fc2"])


def init_params(key, embedding_dim, hidden_size):
    E, H = embedding_dim, hidden_size
    ks = jax.random.split(key, 8)
    s = 1.0 / float(jnp.sqrt(H))
    w_ih = jax.random.uniform(ks[0], (4 * H, E), jnp.float32, -s, s)   # PyTorch weight_ih_l0
    w_hh = jax.random.uniform(ks[1], (4 * H, H), jnp.float32, -s, s)   # PyTorch weight_hh_l0
    b_ih = jax.random.uniform(ks[2], (4 * H,), jnp.float32, -s, s)
    b_hh = jax.random.uniform(ks[3], (4 * H,), jnp.float32, -s, s)
    w_fc1 = jax.random.uniform(ks[4], (H, H), jnp.float32, -s, s)
    b_fc1 = jax.random.uniform(ks[5], (H,), jnp.float32, -s, s)
    w_fc2 = jax.random.uniform(ks[6], (512, H), jnp.float32, -s, s)
    b_fc2 = jax.random.uniform(ks[7], (512,), jnp.float32, -s, s)

    # Zero-pad fc1's output features to a full 128-lane width (lane-dense epilogue).
    Hp = max(128, ((H + 127) // 128) * 128)
    w_fc1_t = w_fc1.T                                                   # (H, H)
    w_fc1_t_pad = jnp.zeros((H, Hp), jnp.float32).at[:, :H].set(w_fc1_t)
    b_fc1_pad = jnp.zeros((1, Hp), jnp.float32).at[:, :H].set(b_fc1)
    w_fc2_t = w_fc2.T                                                   # (H, 512)
    w_fc2_t_pad = jnp.zeros((Hp, 512), jnp.float32).at[:H, :].set(w_fc2_t)

    return {
        "w_ih_t": w_ih.T,                                   # (E, 4H)
        "w_hh_t": w_hh.T,                                   # (H, 4H)
        "b_gates": (b_ih + b_hh).reshape(1, 4 * H),         # (1, 4H)
        "w_fc1_t_pad": w_fc1_t_pad, "b_fc1_pad": b_fc1_pad, # padded for the kernel
        "w_fc2_t_pad": w_fc2_t_pad, "b_fc2": b_fc2.reshape(1, 512),
        # unpadded copies for the pure-JAX reference:
        "w_fc1_t": w_fc1_t, "b_fc1": b_fc1.reshape(1, H), "w_fc2_t": w_fc2_t,
    }


def reference_forward(x, p):
    """Pure-JAX reference (mirrors the PyTorch semantics with noise_epsilon=0, dropout=0)."""
    B, T, E = x.shape
    H = p["w_hh_t"].shape[0]
    h = jnp.zeros((B, H), jnp.float32)
    c = jnp.zeros((B, H), jnp.float32)
    for t in range(T):
        gates = x[:, t, :] @ p["w_ih_t"] + h @ p["w_hh_t"] + p["b_gates"]
        i = jax.nn.sigmoid(gates[:, :H])
        f = jax.nn.sigmoid(gates[:, H:2 * H])
        g = jnp.tanh(gates[:, 2 * H:3 * H])
        o = jax.nn.sigmoid(gates[:, 3 * H:])
        c = f * c + i * g
        h = o * jnp.tanh(c)
    hid = jnp.maximum(h @ p["w_fc1_t"] + p["b_fc1"], 0.0)
    return hid @ p["w_fc2_t"] + p["b_fc2"]


if __name__ == "__main__":
    B, T = 1, 8                 # batch must be 1 (module asserts output shape (1, 512))
    E = H = 32                  # module requires embedding_dim == hidden_size (h0 uses x.size(2))

    key = jax.random.PRNGKey(0)
    kx, kp = jax.random.split(key)
    x = jax.random.normal(kx, (B, T, E), jnp.float32)
    params = init_params(kp, E, H)

    out = module5_forward(x, params)
    out = jax.block_until_ready(out)
    assert out.shape == (1, 512), out.shape

    ref = reference_forward(x, params)
    assert jnp.allclose(out, ref, atol=1e-4, rtol=1e-4), float(jnp.max(jnp.abs(out - ref)))

    print("KERNEL_OK")
</pallas_src>

<mosaic_0001>
module attributes {stable_mosaic.version = 11 : i64} {
  func.func @lstm_mlp_kernel(%arg0: memref<8x32xf32, #tpu.memory_space<vmem>>, %arg1: memref<32x128xf32, #tpu.memory_space<vmem>>, %arg2: memref<32x128xf32, #tpu.memory_space<vmem>>, %arg3: memref<1x128xf32, #tpu.memory_space<vmem>>, %arg4: memref<32x128xf32, #tpu.memory_space<vmem>>, %arg5: memref<1x128xf32, #tpu.memory_space<vmem>>, %arg6: memref<128x512xf32, #tpu.memory_space<any>>, %arg7: memref<1x512xf32, #tpu.memory_space<vmem>>, %arg8: memref<1x512xf32, #tpu.memory_space<vmem>>, %arg9: memref<128x512xf32, #tpu.memory_space<vmem>>, %arg10: memref<!tpu.dma_semaphore, #tpu.memory_space<semaphore_mem>>) attributes {dimension_semantics = [], scalar_prefetch = 0 : i64, scratch_operands = 2 : i64, tpu.core_type = #tpu.core_type<tc>} {
    tpu.enqueue_dma source(%arg6 : memref<128x512xf32, #tpu.memory_space<any>>) target(%arg9 : memref<128x512xf32, #tpu.memory_space<vmem>>) target_semaphore(%arg10 : memref<!tpu.dma_semaphore, #tpu.memory_space<semaphore_mem>>)
    %c0 = arith.constant 0 : index
    %c0_0 = arith.constant 0 : index
    %0 = vector.load %arg0[%c0, %c0_0] : memref<8x32xf32, #tpu.memory_space<vmem>>, vector<8x32xf32>
    %c0_1 = arith.constant 0 : index
    %c0_2 = arith.constant 0 : index
    %1 = vector.load %arg1[%c0_1, %c0_2] : memref<32x128xf32, #tpu.memory_space<vmem>>, vector<32x128xf32>
    %cst = arith.constant dense<0.000000e+00> : vector<8x128xf32>
    %2 = tpu.matmul %0, %1, %cst {dimension_numbers = #tpu.dot_dimension_numbers<[1], [0], [0], [1], [0, 0, 1, 1], [], []>} : vector<8x32xf32>, vector<32x128xf32>, vector<8x128xf32> -> vector<8x128xf32>
    %c0_3 = arith.constant 0 : index
    %c0_4 = arith.constant 0 : index
    %3 = vector.load %arg3[%c0_3, %c0_4] : memref<1x128xf32, #tpu.memory_space<vmem>>, vector<1x128xf32>
    %4 = vector.broadcast %3 : vector<1x128xf32> to vector<8x128xf32>
    %5 = arith.addf %2, %4 : vector<8x128xf32>
    %c0_5 = arith.constant 0 : index
    %c0_6 = arith.constant 0 : index
    %6 = vector.load %arg2[%c0_5, %c0_6] : memref<32x128xf32, #tpu.memory_space<vmem>>, vector<32x128xf32>
    %cst_7 = arith.constant 0.000000e+00 : f32
    %7 = vector.broadcast %cst_7 : f32 to vector<1x32xf32>
    %cst_8 = arith.constant 0.000000e+00 : f32
    %8 = vector.broadcast %cst_8 : f32 to vector<1x32xf32>
    %9 = vector.extract_strided_slice %5 {offsets = [0, 0], sizes = [1, 128], strides = [1, 1]} : vector<8x128xf32> to vector<1x128xf32>
    %cst_9 = arith.constant dense<0.000000e+00> : vector<1x128xf32>
    %10 = tpu.matmul %7, %6, %cst_9 {dimension_numbers = #tpu.dot_dimension_numbers<[1], [0], [0], [1], [0, 0, 1, 1], [], []>} : vector<1x32xf32>, vector<32x128xf32>, vector<1x128xf32> -> vector<1x128xf32>
    %11 = arith.addf %9, %10 : vector<1x128xf32>
    %12 = arith.negf %11 : vector<1x128xf32>
    %13 = math.exp %12 : vector<1x128xf32>
    %cst_10 = arith.constant 1.000000e+00 : f32
    %14 = vector.broadcast %cst_10 : f32 to vector<1x128xf32>
    %15 = arith.addf %14, %13 : vector<1x128xf32>
    %16 = arith.divf %14, %15 : vector<1x128xf32>
    %17 = math.tanh %11 : vector<1x128xf32>
    %18 = vector.extract_strided_slice %16 {offsets = [0, 0], sizes = [1, 32], strides = [1, 1]} : vector<1x128xf32> to vector<1x32xf32>
    %19 = vector.extract_strided_slice %16 {offsets = [0, 32], sizes = [1, 32], strides = [1, 1]} : vector<1x128xf32> to vector<1x32xf32>
    %20 = vector.extract_strided_slice %17 {offsets = [0, 64], sizes = [1, 32], strides = [1, 1]} : vector<1x128xf32> to vector<1x32xf32>
    %21 = vector.extract_strided_slice %16 {offsets = [0, 96], sizes = [1, 32], strides = [1, 1]} : vector<1x128xf32> to vector<1x32xf32>
    %22 = arith.mulf %19, %8 : vector<1x32xf32>
    %23 = arith.mulf %18, %20 : vector<1x32xf32>
    %24 = arith.addf %22, %23 : vector<1x32xf32>
    %25 = math.tanh %24 : vector<1x32xf32>
    %26 = arith.mulf %21, %25 : vector<1x32xf32>
    %27 = vector.extract_strided_slice %5 {offsets = [1, 0], sizes = [1, 128], strides = [1, 1]} : vector<8x128xf32> to vector<1x128xf32>
    %cst_11 = arith.constant dense<0.000000e+00> : vector<1x128xf32>
    %28 = tpu.matmul %26, %6, %cst_11 {dimension_numbers = #tpu.dot_dimension_numbers<[1], [0], [0], [1], [0, 0, 1, 1], [], []>} : vector<1x32xf32>, vector<32x128xf32>, vector<1x128xf32> -> vector<1x128xf32>
    %29 = arith.addf %27, %28 : vector<1x128xf32>
    %30 = arith.negf %29 : vector<1x128xf32>
    %31 = math.exp %30 : vector<1x128xf32>
    %cst_12 = arith.constant 1.000000e+00 : f32
    %32 = vector.broadcast %cst_12 : f32 to vector<1x128xf32>
    %33 = arith.addf %32, %31 : vector<1x128xf32>
    %34 = arith.divf %32, %33 : vector<1x128xf32>
    %35 = math.tanh %29 : vector<1x128xf32>
    %36 = vector.extract_strided_slice %34 {offsets = [0, 0], sizes = [1, 32], strides = [1, 1]} : vector<1x128xf32> to vector<1x32xf32>
    %37 = vector.extract_strided_slice %34 {offsets = [0, 32], sizes = [1, 32], strides = [1, 1]} : vector<1x128xf32> to vector<1x32xf32>
    %38 = vector.extract_strided_slice %35 {offsets = [0, 64], sizes = [1, 32], strides = [1, 1]} : vector<1x128xf32> to vector<1x32xf32>
    %39 = vector.extract_strided_slice %34 {offsets = [0, 96], sizes = [1, 32], strides = [1, 1]} : vector<1x128xf32> to vector<1x32xf32>
    %40 = arith.mulf %37, %24 : vector<1x32xf32>
    %41 = arith.mulf %36, %38 : vector<1x32xf32>
    %42 = arith.addf %40, %41 : vector<1x32xf32>
    %43 = math.tanh %42 : vector<1x32xf32>
    %44 = arith.mulf %39, %43 : vector<1x32xf32>
    %45 = vector.extract_strided_slice %5 {offsets = [2, 0], sizes = [1, 128], strides = [1, 1]} : vector<8x128xf32> to vector<1x128xf32>
    %cst_13 = arith.constant dense<0.000000e+00> : vector<1x128xf32>
    %46 = tpu.matmul %44, %6, %cst_13 {dimension_numbers = #tpu.dot_dimension_numbers<[1], [0], [0], [1], [0, 0, 1, 1], [], []>} : vector<1x32xf32>, vector<32x128xf32>, vector<1x128xf32> -> vector<1x128xf32>
    %47 = arith.addf %45, %46 : vector<1x128xf32>
    %48 = arith.negf %47 : vector<1x128xf32>
    %49 = math.exp %48 : vector<1x128xf32>
    %cst_14 = arith.constant 1.000000e+00 : f32
    %50 = vector.broadcast %cst_14 : f32 to vector<1x128xf32>
    %51 = arith.addf %50, %49 : vector<1x128xf32>
    %52 = arith.divf %50, %51 : vector<1x128xf32>
    %53 = math.tanh %47 : vector<1x128xf32>
    %54 = vector.extract_strided_slice %52 {offsets = [0, 0], sizes = [1, 32], strides = [1, 1]} : vector<1x128xf32> to vector<1x32xf32>
    %55 = vector.extract_strided_slice %52 {offsets = [0, 32], sizes = [1, 32], strides = [1, 1]} : vector<1x128xf32> to vector<1x32xf32>
    %56 = vector.extract_strided_slice %53 {offsets = [0, 64], sizes = [1, 32], strides = [1, 1]} : vector<1x128xf32> to vector<1x32xf32>
    %57 = vector.extract_strided_slice %52 {offsets = [0, 96], sizes = [1, 32], strides = [1, 1]} : vector<1x128xf32> to vector<1x32xf32>
    %58 = arith.mulf %55, %42 : vector<1x32xf32>
    %59 = arith.mulf %54, %56 : vector<1x32xf32>
    %60 = arith.addf %58, %59 : vector<1x32xf32>
    %61 = math.tanh %60 : vector<1x32xf32>
    %62 = arith.mulf %57, %61 : vector<1x32xf32>
    %63 = vector.extract_strided_slice %5 {offsets = [3, 0], sizes = [1, 128], strides = [1, 1]} : vector<8x128xf32> to vector<1x128xf32>
    %cst_15 = arith.constant dense<0.000000e+00> : vector<1x128xf32>
    %64 = tpu.matmul %62, %6, %cst_15 {dimension_numbers = #tpu.dot_dimension_numbers<[1], [0], [0], [1], [0, 0, 1, 1], [], []>} : vector<1x32xf32>, vector<32x128xf32>, vector<1x128xf32> -> vector<1x128xf32>
    %65 = arith.addf %63, %64 : vector<1x128xf32>
    %66 = arith.negf %65 : vector<1x128xf32>
    %67 = math.exp %66 : vector<1x128xf32>
    %cst_16 = arith.constant 1.000000e+00 : f32
    %68 = vector.broadcast %cst_16 : f32 to vector<1x128xf32>
    %69 = arith.addf %68, %67 : vector<1x128xf32>
    %70 = arith.divf %68, %69 : vector<1x128xf32>
    %71 = math.tanh %65 : vector<1x128xf32>
    %72 = vector.extract_strided_slice %70 {offsets = [0, 0], sizes = [1, 32], strides = [1, 1]} : vector<1x128xf32> to vector<1x32xf32>
    %73 = vector.extract_strided_slice %70 {offsets = [0, 32], sizes = [1, 32], strides = [1, 1]} : vector<1x128xf32> to vector<1x32xf32>
    %74 = vector.extract_strided_slice %71 {offsets = [0, 64], sizes = [1, 32], strides = [1, 1]} : vector<1x128xf32> to vector<1x32xf32>
    %75 = vector.extract_strided_slice %70 {offsets = [0, 96], sizes = [1, 32], strides = [1, 1]} : vector<1x128xf32> to vector<1x32xf32>
    %76 = arith.mulf %73, %60 : vector<1x32xf32>
    %77 = arith.mulf %72, %74 : vector<1x32xf32>
    %78 = arith.addf %76, %77 : vector<1x32xf32>
    %79 = math.tanh %78 : vector<1x32xf32>
    %80 = arith.mulf %75, %79 : vector<1x32xf32>
    %81 = vector.extract_strided_slice %5 {offsets = [4, 0], sizes = [1, 128], strides = [1, 1]} : vector<8x128xf32> to vector<1x128xf32>
    %cst_17 = arith.constant dense<0.000000e+00> : vector<1x128xf32>
    %82 = tpu.matmul %80, %6, %cst_17 {dimension_numbers = #tpu.dot_dimension_numbers<[1], [0], [0], [1], [0, 0, 1, 1], [], []>} : vector<1x32xf32>, vector<32x128xf32>, vector<1x128xf32> -> vector<1x128xf32>
    %83 = arith.addf %81, %82 : vector<1x128xf32>
    %84 = arith.negf %83 : vector<1x128xf32>
    %85 = math.exp %84 : vector<1x128xf32>
    %cst_18 = arith.constant 1.000000e+00 : f32
    %86 = vector.broadcast %cst_18 : f32 to vector<1x128xf32>
    %87 = arith.addf %86, %85 : vector<1x128xf32>
    %88 = arith.divf %86, %87 : vector<1x128xf32>
    %89 = math.tanh %83 : vector<1x128xf32>
    %90 = vector.extract_strided_slice %88 {offsets = [0, 0], sizes = [1, 32], strides = [1, 1]} : vector<1x128xf32> to vector<1x32xf32>
    %91 = vector.extract_strided_slice %88 {offsets = [0, 32], sizes = [1, 32], strides = [1, 1]} : vector<1x128xf32> to vector<1x32xf32>
    %92 = vector.extract_strided_slice %89 {offsets = [0, 64], sizes = [1, 32], strides = [1, 1]} : vector<1x128xf32> to vector<1x32xf32>
    %93 = vector.extract_strided_slice %88 {offsets = [0, 96], sizes = [1, 32], strides = [1, 1]} : vector<1x128xf32> to vector<1x32xf32>
    %94 = arith.mulf %91, %78 : vector<1x32xf32>
    %95 = arith.mulf %90, %92 : vector<1x32xf32>
    %96 = arith.addf %94, %95 : vector<1x32xf32>
    %97 = math.tanh %96 : vector<1x32xf32>
    %98 = arith.mulf %93, %97 : vector<1x32xf32>
    %99 = vector.extract_strided_slice %5 {offsets = [5, 0], sizes = [1, 128], strides = [1, 1]} : vector<8x128xf32> to vector<1x128xf32>
    %cst_19 = arith.constant dense<0.000000e+00> : vector<1x128xf32>
    %100 = tpu.matmul %98, %6, %cst_19 {dimension_numbers = #tpu.dot_dimension_numbers<[1], [0], [0], [1], [0, 0, 1, 1], [], []>} : vector<1x32xf32>, vector<32x128xf32>, vector<1x128xf32> -> vector<1x128xf32>
    %101 = arith.addf %99, %100 : vector<1x128xf32>
    %102 = arith.negf %101 : vector<1x128xf32>
    %103 = math.exp %102 : vector<1x128xf32>
    %cst_20 = arith.constant 1.000000e+00 : f32
    %104 = vector.broadcast %cst_20 : f32 to vector<1x128xf32>
    %105 = arith.addf %104, %103 : vector<1x128xf32>
    %106 = arith.divf %104, %105 : vector<1x128xf32>
    %107 = math.tanh %101 : vector<1x128xf32>
    %108 = vector.extract_strided_slice %106 {offsets = [0, 0], sizes = [1, 32], strides = [1, 1]} : vector<1x128xf32> to vector<1x32xf32>
    %109 = vector.extract_strided_slice %106 {offsets = [0, 32], sizes = [1, 32], strides = [1, 1]} : vector<1x128xf32> to vector<1x32xf32>
    %110 = vector.extract_strided_slice %107 {offsets = [0, 64], sizes = [1, 32], strides = [1, 1]} : vector<1x128xf32> to vector<1x32xf32>
    %111 = vector.extract_strided_slice %106 {offsets = [0, 96], sizes = [1, 32], strides = [1, 1]} : vector<1x128xf32> to vector<1x32xf32>
    %112 = arith.mulf %109, %96 : vector<1x32xf32>
    %113 = arith.mulf %108, %110 : vector<1x32xf32>
    %114 = arith.addf %112, %113 : vector<1x32xf32>
    %115 = math.tanh %114 : vector<1x32xf32>
    %116 = arith.mulf %111, %115 : vector<1x32xf32>
    %117 = vector.extract_strided_slice %5 {offsets = [6, 0], sizes = [1, 128], strides = [1, 1]} : vector<8x128xf32> to vector<1x128xf32>
    %cst_21 = arith.constant dense<0.000000e+00> : vector<1x128xf32>
    %118 = tpu.matmul %116, %6, %cst_21 {dimension_numbers = #tpu.dot_dimension_numbers<[1], [0], [0], [1], [0, 0, 1, 1], [], []>} : vector<1x32xf32>, vector<32x128xf32>, vector<1x128xf32> -> vector<1x128xf32>
    %119 = arith.addf %117, %118 : vector<1x128xf32>
    %120 = arith.negf %119 : vector<1x128xf32>
    %121 = math.exp %120 : vector<1x128xf32>
    %cst_22 = arith.constant 1.000000e+00 : f32
    %122 = vector.broadcast %cst_22 : f32 to vector<1x128xf32>
    %123 = arith.addf %122, %121 : vector<1x128xf32>
    %124 = arith.divf %122, %123 : vector<1x128xf32>
    %125 = math.tanh %119 : vector<1x128xf32>
    %126 = vector.extract_strided_slice %124 {offsets = [0, 0], sizes = [1, 32], strides = [1, 1]} : vector<1x128xf32> to vector<1x32xf32>
    %127 = vector.extract_strided_slice %124 {offsets = [0, 32], sizes = [1, 32], strides = [1, 1]} : vector<1x128xf32> to vector<1x32xf32>
    %128 = vector.extract_strided_slice %125 {offsets = [0, 64], sizes = [1, 32], strides = [1, 1]} : vector<1x128xf32> to vector<1x32xf32>
    %129 = vector.extract_strided_slice %124 {offsets = [0, 96], sizes = [1, 32], strides = [1, 1]} : vector<1x128xf32> to vector<1x32xf32>
    %130 = arith.mulf %127, %114 : vector<1x32xf32>
    %131 = arith.mulf %126, %128 : vector<1x32xf32>
    %132 = arith.addf %130, %131 : vector<1x32xf32>
    %133 = math.tanh %132 : vector<1x32xf32>
    %134 = arith.mulf %129, %133 : vector<1x32xf32>
    %135 = vector.extract_strided_slice %5 {offsets = [7, 0], sizes = [1, 128], strides = [1, 1]} : vector<8x128xf32> to vector<1x128xf32>
    %cst_23 = arith.constant dense<0.000000e+00> : vector<1x128xf32>
    %136 = tpu.matmul %134, %6, %cst_23 {dimension_numbers = #tpu.dot_dimension_numbers<[1], [0], [0], [1], [0, 0, 1, 1], [], []>} : vector<1x32xf32>, vector<32x128xf32>, vector<1x128xf32> -> vector<1x128xf32>
    %137 = arith.addf %135, %136 : vector<1x128xf32>
    %138 = arith.negf %137 : vector<1x128xf32>
    %139 = math.exp %138 : vector<1x128xf32>
    %cst_24 = arith.constant 1.000000e+00 : f32
    %140 = vector.broadcast %cst_24 : f32 to vector<1x128xf32>
    %141 = arith.addf %140, %139 : vector<1x128xf32>
    %142 = arith.divf %140, %141 : vector<1x128xf32>
    %143 = math.tanh %137 : vector<1x128xf32>
    %144 = vector.extract_strided_slice %142 {offsets = [0, 0], sizes = [1, 32], strides = [1, 1]} : vector<1x128xf32> to vector<1x32xf32>
    %145 = vector.extract_strided_slice %142 {offsets = [0, 32], sizes = [1, 32], strides = [1, 1]} : vector<1x128xf32> to vector<1x32xf32>
    %146 = vector.extract_strided_slice %143 {offsets = [0, 64], sizes = [1, 32], strides = [1, 1]} : vector<1x128xf32> to vector<1x32xf32>
    %147 = vector.extract_strided_slice %142 {offsets = [0, 96], sizes = [1, 32], strides = [1, 1]} : vector<1x128xf32> to vector<1x32xf32>
    %148 = arith.mulf %145, %132 : vector<1x32xf32>
    %149 = arith.mulf %144, %146 : vector<1x32xf32>
    %150 = arith.addf %148, %149 : vector<1x32xf32>
    %151 = math.tanh %150 : vector<1x32xf32>
    %152 = arith.mulf %147, %151 : vector<1x32xf32>
    %c0_25 = arith.constant 0 : index
    %c0_26 = arith.constant 0 : index
    %153 = vector.load %arg4[%c0_25, %c0_26] : memref<32x128xf32, #tpu.memory_space<vmem>>, vector<32x128xf32>
    %cst_27 = arith.constant dense<0.000000e+00> : vector<1x128xf32>
    %154 = tpu.matmul %152, %153, %cst_27 {dimension_numbers = #tpu.dot_dimension_numbers<[1], [0], [0], [1], [0, 0, 1, 1], [], []>} : vector<1x32xf32>, vector<32x128xf32>, vector<1x128xf32> -> vector<1x128xf32>
    %c0_28 = arith.constant 0 : index
    %c0_29 = arith.constant 0 : index
    %155 = vector.load %arg5[%c0_28, %c0_29] : memref<1x128xf32, #tpu.memory_space<vmem>>, vector<1x128xf32>
    %156 = arith.addf %154, %155 : vector<1x128xf32>
    %cst_30 = arith.constant 0.000000e+00 : f32
    %157 = vector.broadcast %cst_30 : f32 to vector<1x128xf32>
    %158 = arith.maximumf %156, %157 : vector<1x128xf32>
    tpu.wait_dma2 semaphore(%arg10 : memref<!tpu.dma_semaphore, #tpu.memory_space<semaphore_mem>>) src(%arg6 : memref<128x512xf32, #tpu.memory_space<any>>) dst(%arg9 : memref<128x512xf32, #tpu.memory_space<vmem>>)
    %c0_31 = arith.constant 0 : index
    %c0_32 = arith.constant 0 : index
    %159 = vector.load %arg9[%c0_31, %c0_32] : memref<128x512xf32, #tpu.memory_space<vmem>>, vector<128x512xf32>
    %cst_33 = arith.constant dense<0.000000e+00> : vector<1x512xf32>
    %160 = tpu.matmul %158, %159, %cst_33 {dimension_numbers = #tpu.dot_dimension_numbers<[1], [0], [0], [1], [0, 0, 1, 1], [], []>} : vector<1x128xf32>, vector<128x512xf32>, vector<1x512xf32> -> vector<1x512xf32>
    %c0_34 = arith.constant 0 : index
    %c0_35 = arith.constant 0 : index
    %161 = vector.load %arg7[%c0_34, %c0_35] : memref<1x512xf32, #tpu.memory_space<vmem>>, vector<1x512xf32>
    %162 = arith.addf %160, %161 : vector<1x512xf32>
    %c0_36 = arith.constant 0 : index
    %c0_37 = arith.constant 0 : index
    %163 = vector.load %arg8[%c0_36, %c0_37] : memref<1x512xf32, #tpu.memory_space<vmem>>, vector<1x512xf32>
    tpu.vector_store %arg8[%c0_36, %c0_37], %162 {strides = array<i32>} : memref<1x512xf32, #tpu.memory_space<vmem>>, vector<1x512xf32>,
    return
  }
}

</mosaic_0001>

<bundles_post_ra>
// kernel: tpu_custom_call.1
= control target key start
LH: loop header
LB: loop body
LE: loop exit
PB: predicated region body
PF: predicated region fallthrough
CT: control target
= control target key end

     0   :  { %13 = vsyncpa [#allocation5], 0  ;;  %s2040_s0 = inlined_call_operand.hbm [shape: f32[8,32], index: 0, kind: input, shape index: {}]   ;;  %s2041_s1 = inlined_call_operand.hbm [shape: f32[32,128], index: 1, kind: input, shape index: {}]   ;;  %s2042_s2 = inlined_call_operand.hbm [shape: f32[32,128], index: 2, kind: input, shape index: {}]   ;;  %s2043_s3 = inlined_call_operand.vmem [shape: f32[1,128], index: 3, kind: input, shape index: {}]   ;;  %s2044_s4 = inlined_call_operand.hbm [shape: f32[32,128], index: 4, kind: input, shape index: {}]   ;;  %s2045_s5 = inlined_call_operand.vmem [shape: f32[1,128], index: 5, kind: input, shape index: {}]   ;;  %s2046_s6 = inlined_call_operand.hbm [shape: f32[128,512], index: 6, kind: input, shape index: {}]   ;;  %s2047_s7 = inlined_call_operand.vmem [shape: f32[1,512], index: 7, kind: input, shape index: {}]   ;;  %s2048_s8 = inlined_call_operand.hbm [shape: f32[1,512], index: 8, kind: output, shape index: {}]  }
   0x1   :  { %14 = vsyncpa [#allocation8], 0 }
   0x2   :  { %15 = vsyncpa [#allocation11], 0 }
   0x3   :  { %16 = vsyncpa [#allocation6], 0  ;;  %s1785_s27 = smov [#allocation7]  }
   0x4   :  { %s32_s28 = sshll.u32 %s1785_s27, 4  ;;  %s33_s28 = int_to_ptr.vmem [resolvable:$true] %s32_s28 }
   0x5   :  { %s1663_s29 = scalar_lea.vmem %s33_s28, 512  ;;  %p1668_p1 = scmp.lt.s32.totalorder %s33_s28, %s33_s28 }
   0x6   :  { %p1664_p0 = scmp.ne.s32.totalorder %s33_s28, %s1663_s29  ;;  %p1669_p2 = scmp.lt.s32.totalorder %s1663_s29, %s1663_s29 }
   0x8   :  { %p1670_p3 = por %p1669_p2, %p1668_p1 }
   0xa   :  { %p1671_p4 = pnand %p1670_p3, %p1664_p0 }
   0xc   :  { %1674 = shalt.err (!%p1671_p4)
}
   0xd   :  { %s1786_s30 = smov 128   ;;  %s1787_s9 = smov 8  }
   0xe   :  { %38 = dma.hbm_to_vmem [thread:$0]  %s2041_s1, 512, %s33_s28, [#allocation8], %s1786_s30, %s1786_s30, %s1787_s9  }
   0xf   :  { %s1788_s12 = smov [#allocation4]   ;;  %s1789_s14 = smov [#allocation9]  }
  0x10   :  { %s23_s13 = sshll.u32 %s1788_s12, 4  ;;  %s44_s15 = sshll.u32 %s1789_s14, 4  ;;  %s24_s13 = int_to_ptr.vmem [resolvable:$true] %s23_s13  ;;  %s45_s15 = int_to_ptr.vmem [resolvable:$true] %s44_s15 }
  0x11   :  { %s1683_s16 = scalar_lea.vmem %s24_s13, 128  ;;  %p1688_p6 = scmp.lt.s32.totalorder %s24_s13, %s24_s13 }
  0x12   :  { %p1684_p5 = scmp.ne.s32.totalorder %s24_s13, %s1683_s16  ;;  %p1689_p7 = scmp.lt.s32.totalorder %s1683_s16, %s1683_s16 }
  0x14   :  { %p1690_p8 = por %p1689_p7, %p1688_p6 }
  0x16   :  { %p1691_p9 = pnand %p1690_p8, %p1684_p5 }
  0x18   :  { %1694 = shalt.err (!%p1691_p9)
}
  0x19   :  { %26 = dma.hbm_to_vmem [thread:$0]  %s2040_s0, 128, %s24_s13, [#allocation5]  }
  0x1a   :  { %s1703_s19 = scalar_lea.vmem %s45_s15, 512  ;;  %p1708_p11 = scmp.lt.s32.totalorder %s45_s15, %s45_s15 }
  0x1b   :  { %p1704_p10 = scmp.ne.s32.totalorder %s45_s15, %s1703_s19  ;;  %p1709_p12 = scmp.lt.s32.totalorder %s1703_s19, %s1703_s19 }
  0x1d   :  { %p1710_p13 = por %p1709_p12, %p1708_p11 }
  0x1f   :  { %p1711_p0 = pnand %p1710_p13, %p1704_p10 }
  0x21   :  { %1714 = shalt.err (!%p1711_p0)
}
  0x22   :  { %50 = dma.hbm_to_vmem [thread:$0]  %s2042_s2, 512, %s45_s15, [#allocation8], %s1786_s30, %s1786_s30, %s1787_s9  }
  0x23   :  { %s1790_s21 = smov [#allocation10]  }
  0x24   :  { %s58_s22 = sshll.u32 %s1790_s21, 4  ;;  %s59_s22 = int_to_ptr.vmem [resolvable:$true] %s58_s22 }
  0x25   :  { %s1723_s23 = scalar_lea.vmem %s59_s22, 512  ;;  %p1728_p2 = scmp.lt.s32.totalorder %s59_s22, %s59_s22 }
  0x26   :  { %p1724_p1 = scmp.ne.s32.totalorder %s59_s22, %s1723_s23  ;;  %p1729_p3 = scmp.lt.s32.totalorder %s1723_s23, %s1723_s23 }
  0x28   :  { %p1730_p4 = por %p1729_p3, %p1728_p2 }
  0x2a   :  { %p1731_p5 = pnand %p1730_p4, %p1724_p1 }
  0x2c   :  { %1734 = shalt.err (!%p1731_p5)
}
  0x2d   :  { %64 = dma.hbm_to_vmem [thread:$0]  %s2044_s4, 512, %s59_s22, [#allocation11], %s1786_s30, %s1786_s30, %s1787_s9  }
  0x2e   :  { %1775 = dma.done.wait [#allocation5], 128  }
  0x2f   :  { %1776 = vsyncadd [#allocation5], 4294967168 }
  0x30   :  { %1777 = dma.done.wait [#allocation8], 1024  }
  0x31   :  { %1778 = vsyncadd [#allocation8], 4294966272 }
  0x32   :  { %1779 = dma.done.wait [#allocation11], 512  }
  0x33   :  { %1780 = vsyncadd [#allocation11], 4294966784  ;;  %v1791_v0 = vmov 0.0   ;;  %vm1792_vm0 = vmmov 0   ;;  %v96_v1 = vld [vmem:[#allocation7 + $0x18] sm:$0xff]  ;;  %v95_v3 = vld [vmem:[#allocation7 + $0x10] sm:$0xff] }
  0x34   :  { %1468 = vmatprep.subr.mxu0 %v1791_v0  ;;  %1479 = vmatprep.subr.mxu1 %v1791_v0  ;;  %v1870_v2 = vld [vmem:[#allocation9 + $0x18] sm:$0xff]  ;;  %v1873_v4 = vld [vmem:[#allocation9 + $0x10] sm:$0xff]  ;;  %v94_v5 = vld [vmem:[#allocation7 + $0x8] sm:$0xff]  ;;  %vm104_vm1 = vcmask 261120   ;;  %s1793_s25 = smov 64   ;;  %s1795_s26 = smov [#allocation2]  }
  0x35   :  { %1476 = vmatprep.mubr.msk.f32.mxu0 %vm1792_vm0, %v1791_v0  ;;  %1487 = vmatprep.mubr.msk.f32.mxu1 %vm1792_vm0, %v1791_v0  ;;  %v1877_v6 = vld [vmem:[#allocation9 + $0x8] sm:$0xff]  ;;  %v93_v7 = vld [vmem:[#allocation7] sm:$0xff]  ;;  %v92_v9 = vld [vmem:[#allocation4] sm:$0xff]  ;;  %s88_s27 = sshll.u32 %s1795_s26, 4  ;;  %s89_s27 = int_to_ptr.vmem [resolvable:$true] %s88_s27 }
  0x36   :  { %1469 = vmatpush3.msra.mxu0 %v96_v1  ;;  %1480 = vmatpush3.msra.mxu1 %v1870_v2  ;;  %v1882_v8 = vld [vmem:[#allocation9] sm:$0xff]  ;;  %v1399_v10 = vld [vmem:[%s2043_s3] ss:$0 sm:$0xff]  ;;  %s1794_s3 = smov 32   ;;  %s1743_s28 = scalar_lea.vmem %s89_s27, 8192 }
  0x37   :  { %1470 = vmatprep.subr.mxu0 %v1791_v0  ;;  %1481 = vmatprep.subr.mxu1 %v1791_v0  ;;  %p1744_p6 = scmp.ne.s32.totalorder %s89_s27, %s1743_s28  ;;  %p1748_p7 = scmp.lt.s32.totalorder %s89_s27, %s89_s27 }
  0x38   :  { %1471 = vmatpush3.msra.mxu0 %v95_v3  ;;  %1482 = vmatpush3.msra.mxu1 %v1873_v4  ;;  %p1749_p8 = scmp.lt.s32.totalorder %s1743_s28, %s1743_s28 }
  0x39   :  { %1472 = vmatprep.subr.mxu0 %v1791_v0  ;;  %1483 = vmatprep.subr.mxu1 %v1791_v0 }
  0x3a   :  { %1473 = vmatpush3.msra.mxu0 %v94_v5  ;;  %1484 = vmatpush3.msra.mxu1 %v1877_v6  ;;  %p1750_p9 = por %p1749_p8, %p1748_p7 }
  0x3b   :  { %1474 = vmatprep.subr.mxu0 %v1791_v0  ;;  %1485 = vmatprep.subr.mxu1 %v1791_v0 }
  0x3c   :  { %1475 = vmatpush3.msra.mxu0 %v93_v7  ;;  %1486 = vmatpush3.msra.mxu1 %v1882_v8  ;;  %p1751_p10 = pnand %p1750_p9, %p1744_p6 }
  0x3d   :  { %1477 = vmatmul.mubr.msk.f32.vlgmr.msra.gmra.mxu0 %vm104_vm1, %v92_v9  ;;  %1488 = vmatmul.mubr.f32.vlgmr.msra.gmra.mxu1 %v1791_v0 }
  0x3e   :  { %1490 = vmatprep.subr.mxu0 %v1791_v0  ;;  %1498 = vmatprep.mubr.msk.f32.mxu0 %vm1792_vm0, %v1791_v0 }
  0x3f   :  { %1491 = vmatpush3.msra.mxu0 %v1870_v2  ;;  %1501 = vmatprep.subr.mxu1 %v1791_v0 }
  0x40   :  { %1492 = vmatprep.subr.mxu0 %v1791_v0  ;;  %1502 = vmatpush3.msra.mxu1 %v1870_v2 }
  0x41   :  { %1493 = vmatpush3.msra.mxu0 %v1873_v4  ;;  %1503 = vmatprep.subr.mxu1 %v1791_v0 }
  0x42   :  { %1494 = vmatprep.subr.mxu0 %v1791_v0  ;;  %1504 = vmatpush3.msra.mxu1 %v1873_v4 }
  0x43   :  { %1495 = vmatpush3.msra.mxu0 %v1877_v6  ;;  %1505 = vmatprep.subr.mxu1 %v1791_v0 }
  0x44   :  { %1496 = vmatprep.subr.mxu0 %v1791_v0  ;;  %1506 = vmatpush3.msra.mxu1 %v1877_v6 }
  0x45   :  { %1497 = vmatpush3.msra.mxu0 %v1882_v8  ;;  %1507 = vmatprep.subr.mxu1 %v1791_v0 }
  0x46   :  { %1508 = vmatpush3.msra.mxu1 %v1882_v8  ;;  %1509 = vmatprep.mubr.msk.f32.mxu1 %vm1792_vm0, %v1791_v0 }
  0x47   :  { %1512 = vmatprep.subr.mxu0 %v1791_v0  ;;  %1523 = vmatprep.subr.mxu1 %v1791_v0 }
  0xfd   :  { %v174_v11 = vpop.f32.mrf.mxu0  ;;  %v251_v12 = vpop.f32.mrf.mxu1 }
  0xfe   :  { %v1915_v13 = vadd.f32 %v1399_v10, %v174_v11 }
  0xff   :  { %v1478_v14 = vpop.f32.mrf.mxu0  ;;  %v1489_v15 = vpop.f32.mrf.mxu1 }
 0x100   :  { %v255_v16 = vadd.f32 %v251_v12, %v1915_v13 }
 0x102   :  { %1591 = vtanh.f32 %v255_v16  ;;  %v1401_v18 = vmul.f32 -1.442695, %v255_v16 }
 0x104   :  { %1593 = vpow2.f32 %v1401_v18 }
 0x10f   :  { %v1592_v17 = vpop.eup %1591 }
 0x110   :  { %265 = vrot.lane.b32.xlu0 %v1592_v17, %s1793_s25 }
 0x111   :  { %v1594_v19 = vpop.eup %1593 }
 0x112   :  { %v259_v20 = vadd.f32 1.0, %v1594_v19 }
 0x114   :  { %1595 = vrcp.f32 %v259_v20 }
 0x121   :  { %v1596_v21 = vpop.eup %1595 }
 0x122   :  { %v263_v24 = vmul.f32 0.0, %v1596_v21 }
 0x182   :  { %v266_v22 = vpop.permute.xlu0 %265 }
 0x183   :  { %v268_v23 = vmul.f32 %v1596_v21, %v266_v22 }
 0x185   :  { %270 = vrot.lane.b32.xlu0 %v268_v23, %s1794_s3 }
 0x1f7   :  { %v271_v25 = vpop.permute.xlu0 %270 }
 0x1f8   :  { %v273_v26 = vadd.f32 %v271_v25, %v263_v24 }
 0x1fa   :  { %1597 = vtanh.f32 %v273_v26  ;;  %v367_v42 = vrot.slane %v273_v26, 7 }
 0x207   :  { %v1598_v27 = vpop.eup %1597 }
 0x208   :  { %276 = vrot.lane.b32.xlu1 %v1598_v27, %s1793_s25 }
 0x27a   :  { %v277_v28 = vpop.permute.xlu1 %276 }
 0x27b   :  { %v279_v29 = vmul.f32 %v1596_v21, %v277_v28 }
 0x27d   :  { %281 = vrot.lane.b32.xlu1 %v279_v29, %s1794_s3 }
 0x2ef   :  { %v282_v30 = vpop.permute.xlu1 %281 }
 0x2f0   :  { %1499 = vmatmul.mubr.msk.f32.vlgmr.msra.gmra.mxu0 %vm104_vm1, %v282_v30 }
 0x2f1   :  { %1513 = vmatpush3.msra.mxu0 %v1870_v2  ;;  %1520 = vmatprep.mubr.msk.f32.mxu0 %vm1792_vm0, %v1791_v0 }
 0x2f2   :  { %1514 = vmatprep.subr.mxu0 %v1791_v0 }
 0x2f3   :  { %1515 = vmatpush3.msra.mxu0 %v1873_v4 }
 0x2f4   :  { %1516 = vmatprep.subr.mxu0 %v1791_v0 }
 0x2f5   :  { %1517 = vmatpush3.msra.mxu0 %v1877_v6 }
 0x2f6   :  { %1518 = vmatprep.subr.mxu0 %v1791_v0 }
 0x2f7   :  { %1519 = vmatpush3.msra.mxu0 %v1882_v8 }
 0x2f8   :  { %1534 = vmatprep.subr.mxu0 %v1791_v0 }
 0x3b0   :  { %v351_v31 = vpop.f32.mrf.mxu0 }
 0x3b1   :  { %v356_v32 = vrot.slane %v351_v31, 7 }
 0x3b2   :  { %v1500_v33 = vpop.f32.mrf.mxu0 }
 0x3b3   :  { %v358_v34 = vadd.f32 %v356_v32, %v1915_v13 }
 0x3b5   :  { %1599 = vtanh.f32 %v358_v34  ;;  %v1403_v36 = vmul.f32 -1.442695, %v358_v34 }
 0x3b7   :  { %1601 = vpow2.f32 %v1403_v36 }
 0x3c2   :  { %v1600_v35 = vpop.eup %1599 }
 0x3c3   :  { %371 = vrot.lane.b32.xlu0 %v1600_v35, %s1793_s25 }
 0x3c4   :  { %v1602_v37 = vpop.eup %1601 }
 0x3c5   :  { %v362_v38 = vadd.f32 1.0, %v1602_v37 }
 0x3c7   :  { %1603 = vrcp.f32 %v362_v38 }
 0x3d4   :  { %v1604_v39 = vpop.eup %1603 }
 0x3d5   :  { %v369_v43 = vmul.f32 %v1604_v39, %v367_v42 }
 0x435   :  { %v372_v40 = vpop.permute.xlu0 %371 }
 0x436   :  { %v374_v41 = vmul.f32 %v1604_v39, %v372_v40 }
 0x438   :  { %376 = vrot.lane.b32.xlu1 %v374_v41, %s1794_s3 }
 0x4aa   :  { %v377_v44 = vpop.permute.xlu1 %376 }
 0x4ab   :  { %v379_v45 = vadd.f32 %v377_v44, %v369_v43 }
 0x4ad   :  { %1605 = vtanh.f32 %v379_v45  ;;  %v474_v62 = vrot.slane %v379_v45, 7 }
 0x4ba   :  { %v1606_v46 = vpop.eup %1605 }
 0x4bb   :  { %382 = vrot.lane.b32.xlu0 %v1606_v46, %s1793_s25 }
 0x52d   :  { %v383_v47 = vpop.permute.xlu0 %382 }
 0x52e   :  { %v385_v48 = vmul.f32 %v1604_v39, %v383_v47 }
 0x530   :  { %v387_v49 = vrot.slane %v385_v48, 1 }
 0x532   :  { %388 = vrot.lane.b32.xlu1 %v387_v49, %s1794_s3 }
 0x5a4   :  { %v389_v50 = vpop.permute.xlu1 %388 }
 0x5a5   :  { %1510 = vmatmul.mubr.msk.f32.vlgmr.msra.gmra.mxu1 %vm104_vm1, %v389_v50 }
 0x5a6   :  { %1524 = vmatpush3.msra.mxu1 %v1870_v2  ;;  %1531 = vmatprep.mubr.msk.f32.mxu1 %vm1792_vm0, %v1791_v0 }
 0x5a7   :  { %1525 = vmatprep.subr.mxu1 %v1791_v0 }
 0x5a8   :  { %1526 = vmatpush3.msra.mxu1 %v1873_v4 }
 0x5a9   :  { %1527 = vmatprep.subr.mxu1 %v1791_v0 }
 0x5aa   :  { %1528 = vmatpush3.msra.mxu1 %v1877_v6 }
 0x5ab   :  { %1529 = vmatprep.subr.mxu1 %v1791_v0 }
 0x5ac   :  { %1530 = vmatpush3.msra.mxu1 %v1882_v8 }
 0x5ad   :  { %1545 = vmatprep.subr.mxu1 %v1791_v0 }
 0x665   :  { %v458_v51 = vpop.f32.mrf.mxu1 }
 0x666   :  { %v463_v52 = vrot.slane %v458_v51, 6 }
 0x667   :  { %v1511_v53 = vpop.f32.mrf.mxu1 }
 0x668   :  { %v465_v54 = vadd.f32 %v463_v52, %v1915_v13 }
 0x66a   :  { %1607 = vtanh.f32 %v465_v54  ;;  %v1405_v56 = vmul.f32 -1.442695, %v465_v54 }
 0x66c   :  { %1609 = vpow2.f32 %v1405_v56 }
 0x677   :  { %v1608_v55 = vpop.eup %1607 }
 0x678   :  { %478 = vrot.lane.b32.xlu0 %v1608_v55, %s1793_s25 }
 0x679   :  { %v1610_v57 = vpop.eup %1609 }
 0x67a   :  { %v469_v58 = vadd.f32 1.0, %v1610_v57 }
 0x67c   :  { %1611 = vrcp.f32 %v469_v58 }
 0x689   :  { %v1612_v59 = vpop.eup %1611 }
 0x68a   :  { %v476_v63 = vmul.f32 %v1612_v59, %v474_v62 }
 0x6ea   :  { %v479_v60 = vpop.permute.xlu0 %478 }
 0x6eb   :  { %v481_v61 = vmul.f32 %v1612_v59, %v479_v60 }
 0x6ed   :  { %483 = vrot.lane.b32.xlu1 %v481_v61, %s1794_s3 }
 0x75f   :  { %v484_v1 = vpop.permute.xlu1 %483 }
 0x760   :  { %v486_v3 = vadd.f32 %v484_v1, %v476_v63 }
 0x762   :  { %1613 = vtanh.f32 %v486_v3  ;;  %v581_v24 = vrot.slane %v486_v3, 7 }
 0x76f   :  { %v1614_v5 = vpop.eup %1613 }
 0x770   :  { %489 = vrot.lane.b32.xlu0 %v1614_v5, %s1793_s25 }
 0x7e2   :  { %v490_v7 = vpop.permute.xlu0 %489 }
 0x7e3   :  { %v492_v9 = vmul.f32 %v1612_v59, %v490_v7 }
 0x7e5   :  { %v494_v10 = vrot.slane %v492_v9, 2 }
 0x7e7   :  { %495 = vrot.lane.b32.xlu1 %v494_v10, %s1794_s3 }
 0x859   :  { %v496_v11 = vpop.permute.xlu1 %495 }
 0x85a   :  { %1521 = vmatmul.mubr.msk.f32.vlgmr.msra.gmra.mxu0 %vm104_vm1, %v496_v11 }
 0x85b   :  { %1535 = vmatpush3.msra.mxu0 %v1870_v2  ;;  %1542 = vmatprep.mubr.msk.f32.mxu0 %vm1792_vm0, %v1791_v0 }
 0x85c   :  { %1536 = vmatprep.subr.mxu0 %v1791_v0 }
 0x85d   :  { %1537 = vmatpush3.msra.mxu0 %v1873_v4 }
 0x85e   :  { %1538 = vmatprep.subr.mxu0 %v1791_v0 }
 0x85f   :  { %1539 = vmatpush3.msra.mxu0 %v1877_v6 }
 0x860   :  { %1540 = vmatprep.subr.mxu0 %v1791_v0 }
 0x861   :  { %1541 = vmatpush3.msra.mxu0 %v1882_v8 }
 0x862   :  { %1556 = vmatprep.subr.mxu0 %v1791_v0 }
 0x91a   :  { %v565_v12 = vpop.f32.mrf.mxu0 }
 0x91b   :  { %v570_v14 = vrot.slane %v565_v12, 5 }
 0x91c   :  { %v1522_v15 = vpop.f32.mrf.mxu0 }
 0x91d   :  { %v572_v16 = vadd.f32 %v570_v14, %v1915_v13 }
 0x91f   :  { %1615 = vtanh.f32 %v572_v16  ;;  %v1407_v18 = vmul.f32 -1.442695, %v572_v16 }
 0x921   :  { %1617 = vpow2.f32 %v1407_v18 }
 0x92c   :  { %v1616_v17 = vpop.eup %1615 }
 0x92d   :  { %585 = vrot.lane.b32.xlu0 %v1616_v17, %s1793_s25 }
 0x92e   :  { %v1618_v19 = vpop.eup %1617 }
 0x92f   :  { %v576_v20 = vadd.f32 1.0, %v1618_v19 }
 0x931   :  { %1619 = vrcp.f32 %v576_v20 }
 0x93e   :  { %v1620_v21 = vpop.eup %1619 }
 0x93f   :  { %v583_v25 = vmul.f32 %v1620_v21, %v581_v24 }
 0x99f   :  { %v586_v22 = vpop.permute.xlu0 %585 }
 0x9a0   :  { %v588_v23 = vmul.f32 %v1620_v21, %v586_v22 }
 0x9a2   :  { %590 = vrot.lane.b32.xlu1 %v588_v23, %s1794_s3 }
 0xa14   :  { %v591_v26 = vpop.permute.xlu1 %590 }
 0xa15   :  { %v593_v27 = vadd.f32 %v591_v26, %v583_v25 }
 0xa17   :  { %1621 = vtanh.f32 %v593_v27  ;;  %v688_v44 = vrot.slane %v593_v27, 7 }
 0xa24   :  { %v1622_v28 = vpop.eup %1621 }
 0xa25   :  { %596 = vrot.lane.b32.xlu0 %v1622_v28, %s1793_s25 }
 0xa97   :  { %v597_v29 = vpop.permute.xlu0 %596 }
 0xa98   :  { %v599_v30 = vmul.f32 %v1620_v21, %v597_v29 }
 0xa9a   :  { %v601_v31 = vrot.slane %v599_v30, 3 }
 0xa9c   :  { %602 = vrot.lane.b32.xlu1 %v601_v31, %s1794_s3 }
 0xb0e   :  { %v603_v32 = vpop.permute.xlu1 %602 }
 0xb0f   :  { %1532 = vmatmul.mubr.msk.f32.vlgmr.msra.gmra.mxu1 %vm104_vm1, %v603_v32 }
 0xb10   :  { %1546 = vmatpush3.msra.mxu1 %v1870_v2  ;;  %1553 = vmatprep.mubr.msk.f32.mxu1 %vm1792_vm0, %v1791_v0 }
 0xb11   :  { %1547 = vmatprep.subr.mxu1 %v1791_v0 }
 0xb12   :  { %1548 = vmatpush3.msra.mxu1 %v1873_v4 }
 0xb13   :  { %1549 = vmatprep.subr.mxu1 %v1791_v0 }
 0xb14   :  { %1550 = vmatpush3.msra.mxu1 %v1877_v6 }
 0xb15   :  { %1551 = vmatprep.subr.mxu1 %v1791_v0 }
 0xb16   :  { %1552 = vmatpush3.msra.mxu1 %v1882_v8 }
 0xb17   :  { %1567 = vmatprep.subr.mxu1 %v1791_v0 }
 0xbcf   :  { %v672_v33 = vpop.f32.mrf.mxu1 }
 0xbd0   :  { %v677_v34 = vrot.slane %v672_v33, 4 }
 0xbd1   :  { %v1533_v35 = vpop.f32.mrf.mxu1 }
 0xbd2   :  { %v679_v36 = vadd.f32 %v677_v34, %v1915_v13 }
 0xbd4   :  { %1623 = vtanh.f32 %v679_v36  ;;  %v1409_v38 = vmul.f32 -1.442695, %v679_v36 }
 0xbd6   :  { %1625 = vpow2.f32 %v1409_v38 }
 0xbe1   :  { %v1624_v37 = vpop.eup %1623 }
 0xbe2   :  { %692 = vrot.lane.b32.xlu0 %v1624_v37, %s1793_s25 }
 0xbe3   :  { %v1626_v39 = vpop.eup %1625 }
 0xbe4   :  { %v683_v40 = vadd.f32 1.0, %v1626_v39 }
 0xbe6   :  { %1627 = vrcp.f32 %v683_v40 }
 0xbf3   :  { %v1628_v41 = vpop.eup %1627 }
 0xbf4   :  { %v690_v45 = vmul.f32 %v1628_v41, %v688_v44 }
 0xc54   :  { %v693_v42 = vpop.permute.xlu0 %692 }
 0xc55   :  { %v695_v43 = vmul.f32 %v1628_v41, %v693_v42 }
 0xc57   :  { %697 = vrot.lane.b32.xlu1 %v695_v43, %s1794_s3 }
 0xcc9   :  { %v698_v46 = vpop.permute.xlu1 %697 }
 0xcca   :  { %v700_v47 = vadd.f32 %v698_v46, %v690_v45  ;;  %v1030_v46 = vld [vmem:[#allocation10 + $0x10] sm:$0xff] }
 0xccc   :  { %1629 = vtanh.f32 %v700_v47 }
 0xcd9   :  { %v1630_v48 = vpop.eup %1629 }
 0xcda   :  { %703 = vrot.lane.b32.xlu0 %v1630_v48, %s1793_s25  ;;  %v1028_v48 = vld [vmem:[#allocation10] sm:$0xff] }
 0xd4c   :  { %v704_v49 = vpop.permute.xlu0 %703 }
 0xd4d   :  { %v706_v50 = vmul.f32 %v1628_v41, %v704_v49 }
 0xd4f   :  { %v708_v51 = vrot.slane %v706_v50, 4 }
 0xd51   :  { %709 = vrot.lane.b32.xlu1 %v708_v51, %s1794_s3 }
 0xdc3   :  { %v710_v52 = vpop.permute.xlu1 %709 }
 0xdc4   :  { %1543 = vmatmul.mubr.msk.f32.vlgmr.msra.gmra.mxu0 %vm104_vm1, %v710_v52 }
 0xdc5   :  { %1557 = vmatpush3.msra.mxu0 %v1870_v2  ;;  %1564 = vmatprep.mubr.msk.f32.mxu0 %vm1792_vm0, %v1791_v0 }
 0xdc6   :  { %1558 = vmatprep.subr.mxu0 %v1791_v0 }
 0xdc7   :  { %1559 = vmatpush3.msra.mxu0 %v1873_v4 }
 0xdc8   :  { %1560 = vmatprep.subr.mxu0 %v1791_v0 }
 0xdc9   :  { %1561 = vmatpush3.msra.mxu0 %v1877_v6 }
 0xdca   :  { %1562 = vmatprep.subr.mxu0 %v1791_v0 }
 0xdcb   :  { %1563 = vmatpush3.msra.mxu0 %v1882_v8  ;;  %v795_v8 = vrot.slane %v700_v47, 7  ;;  %v1029_v47 = vld [vmem:[#allocation10 + $0x8] sm:$0xff] }
 0xe84   :  { %v779_v53 = vpop.f32.mrf.mxu0 }
 0xe85   :  { %v784_v54 = vrot.slane %v779_v53, 3 }
 0xe86   :  { %v1544_v55 = vpop.f32.mrf.mxu0 }
 0xe87   :  { %v786_v2 = vadd.f32 %v784_v54, %v1915_v13 }
 0xe89   :  { %1631 = vtanh.f32 %v786_v2  ;;  %v1411_v57 = vmul.f32 -1.442695, %v786_v2 }
 0xe8b   :  { %1633 = vpow2.f32 %v1411_v57 }
 0xe96   :  { %v1632_v56 = vpop.eup %1631 }
 0xe97   :  { %799 = vrot.lane.b32.xlu0 %v1632_v56, %s1793_s25 }
 0xe98   :  { %v1634_v4 = vpop.eup %1633 }
 0xe99   :  { %v790_v58 = vadd.f32 1.0, %v1634_v4 }
 0xe9b   :  { %1635 = vrcp.f32 %v790_v58 }
 0xea8   :  { %v1636_v59 = vpop.eup %1635 }
 0xea9   :  { %v797_v61 = vmul.f32 %v1636_v59, %v795_v8 }
 0xf09   :  { %v800_v6 = vpop.permute.xlu0 %799 }
 0xf0a   :  { %v802_v60 = vmul.f32 %v1636_v59, %v800_v6 }
 0xf0c   :  { %804 = vrot.lane.b32.xlu1 %v802_v60, %s1794_s3 }
 0xf7e   :  { %v805_v62 = vpop.permute.xlu1 %804 }
 0xf7f   :  { %v807_v63 = vadd.f32 %v805_v62, %v797_v61 }
 0xf81   :  { %1637 = vtanh.f32 %v807_v63  ;;  %v902_v22 = vrot.slane %v807_v63, 7 }
 0xf8e   :  { %v1638_v1 = vpop.eup %1637 }
 0xf8f   :  { %810 = vrot.lane.b32.xlu0 %v1638_v1, %s1793_s25 }
0x1001   :  { %v811_v3 = vpop.permute.xlu0 %810 }
0x1002   :  { %v813_v5 = vmul.f32 %v1636_v59, %v811_v3 }
0x1004   :  { %v815_v7 = vrot.slane %v813_v5, 5 }
0x1006   :  { %816 = vrot.lane.b32.xlu1 %v815_v7, %s1794_s3 }
0x1078   :  { %v817_v9 = vpop.permute.xlu1 %816 }
0x1079   :  { %1554 = vmatmul.mubr.msk.f32.vlgmr.msra.gmra.mxu1 %vm104_vm1, %v817_v9 }
0x107a   :  { %1575 = vmatprep.mubr.msk.f32.mxu1 %vm1792_vm0, %v1791_v0 }
0x1139   :  { %v886_v10 = vpop.f32.mrf.mxu1 }
0x113a   :  { %v891_v11 = vrot.slane %v886_v10, 2 }
0x113b   :  { %v1555_v12 = vpop.f32.mrf.mxu1 }
0x113c   :  { %v893_v14 = vadd.f32 %v891_v11, %v1915_v13 }
0x113e   :  { %1639 = vtanh.f32 %v893_v14  ;;  %v1413_v16 = vmul.f32 -1.442695, %v893_v14 }
0x1140   :  { %1641 = vpow2.f32 %v1413_v16 }
0x114b   :  { %v1640_v15 = vpop.eup %1639 }
0x114c   :  { %906 = vrot.lane.b32.xlu0 %v1640_v15, %s1793_s25 }
0x114d   :  { %v1642_v17 = vpop.eup %1641 }
0x114e   :  { %v897_v18 = vadd.f32 1.0, %v1642_v17 }
0x1150   :  { %1643 = vrcp.f32 %v897_v18 }
0x115d   :  { %v1644_v19 = vpop.eup %1643 }
0x115e   :  { %v904_v23 = vmul.f32 %v1644_v19, %v902_v22 }
0x11be   :  { %v907_v20 = vpop.permute.xlu0 %906 }
0x11bf   :  { %v909_v21 = vmul.f32 %v1644_v19, %v907_v20 }
0x11c1   :  { %911 = vrot.lane.b32.xlu1 %v909_v21, %s1794_s3 }
0x1233   :  { %v912_v24 = vpop.permute.xlu1 %911 }
0x1234   :  { %v914_v25 = vadd.f32 %v912_v24, %v904_v23 }
0x1236   :  { %1645 = vtanh.f32 %v914_v25  ;;  %v1009_v42 = vrot.slane %v914_v25, 7 }
0x1243   :  { %v1646_v26 = vpop.eup %1645 }
0x1244   :  { %917 = vrot.lane.b32.xlu0 %v1646_v26, %s1793_s25 }
0x12b6   :  { %v918_v27 = vpop.permute.xlu0 %917 }
0x12b7   :  { %v920_v28 = vmul.f32 %v1644_v19, %v918_v27 }
0x12b9   :  { %v922_v29 = vrot.slane %v920_v28, 6 }
0x12bb   :  { %923 = vrot.lane.b32.xlu1 %v922_v29, %s1794_s3 }
0x132d   :  { %v924_v30 = vpop.permute.xlu1 %923 }
0x132e   :  { %1565 = vmatmul.mubr.msk.f32.vlgmr.msra.gmra.mxu0 %vm104_vm1, %v924_v30 }
0x13ee   :  { %v993_v31 = vpop.f32.mrf.mxu0 }
0x13ef   :  { %v998_v32 = vrot.slane %v993_v31, 1 }
0x13f0   :  { %v1566_v33 = vpop.f32.mrf.mxu0 }
0x13f1   :  { %v1000_v34 = vadd.f32 %v998_v32, %v1915_v13  ;;  %v1031_v13 = vld [vmem:[#allocation10 + $0x18] sm:$0xff] }
0x13f2   :  { %1568 = vmatpush3.msra.mxu1 %v1031_v13 }
0x13f3   :  { %1647 = vtanh.f32 %v1000_v34  ;;  %v1415_v36 = vmul.f32 -1.442695, %v1000_v34  ;;  %1569 = vmatprep.subr.mxu1 %v1791_v0 }
0x13f4   :  { %1570 = vmatpush3.msra.mxu1 %v1030_v46 }
0x13f5   :  { %1649 = vpow2.f32 %v1415_v36  ;;  %1571 = vmatprep.subr.mxu1 %v1791_v0 }
0x13f6   :  { %1572 = vmatpush3.msra.mxu1 %v1029_v47 }
0x13f7   :  { %1573 = vmatprep.subr.mxu1 %v1791_v0 }
0x13f8   :  { %1574 = vmatpush3.msra.mxu1 %v1028_v48 }
0x1400   :  { %v1648_v35 = vpop.eup %1647 }
0x1401   :  { %1013 = vrot.lane.b32.xlu0 %v1648_v35, %s1793_s25 }
0x1402   :  { %v1650_v37 = vpop.eup %1649 }
0x1403   :  { %v1004_v38 = vadd.f32 1.0, %v1650_v37 }
0x1405   :  { %1651 = vrcp.f32 %v1004_v38 }
0x1412   :  { %v1652_v39 = vpop.eup %1651 }
0x1413   :  { %v1011_v43 = vmul.f32 %v1652_v39, %v1009_v42 }
0x1473   :  { %v1014_v40 = vpop.permute.xlu0 %1013 }
0x1474   :  { %v1016_v41 = vmul.f32 %v1652_v39, %v1014_v40 }
0x1476   :  { %1018 = vrot.lane.b32.xlu1 %v1016_v41, %s1794_s3 }
0x14e8   :  { %v1019_v44 = vpop.permute.xlu1 %1018 }
0x14e9   :  { %v1021_v45 = vadd.f32 %v1019_v44, %v1011_v43 }
0x14eb   :  { %1653 = vtanh.f32 %v1021_v45 }
0x14f8   :  { %v1654_v49 = vpop.eup %1653 }
0x14f9   :  { %1024 = vrot.lane.b32.xlu0 %v1654_v49, %s1793_s25 }
0x156b   :  { %v1025_v50 = vpop.permute.xlu0 %1024 }
0x156c   :  { %v1027_v51 = vmul.f32 %v1652_v39, %v1025_v50 }
0x156e   :  { %v1034_v52 = vrot.slane %v1027_v51, 7 }
0x1570   :  { %1035 = vrot.lane.b32.xlu1 %v1034_v52, %s1794_s3 }
0x15e2   :  { %v1036_v53 = vpop.permute.xlu1 %1035 }
0x15e3   :  { %1576 = vmatmul.mubr.msk.f32.vlgmr.msra.gmra.mxu1 %vm104_vm1, %v1036_v53 }
0x15e4   :  { %1754 = shalt.err (!%p1751_p10)  }
0x15e5   :  { %91 = dma.hbm_to_vmem [thread:$0]  %s2046_s6, 8192, %s89_s27, [#allocation3]  ;;  %v1032_v54 = vld [vmem:[%s2045_s5] sm:$0x1] }
0x16a3   :  { %v1105_v55 = vpop.f32.mrf.mxu1 }
0x16a4   :  { %v2025_v2 = vadd.f32 %v1105_v55, %v1032_v54 }
0x16a5   :  { %v1577_v56 = vpop.f32.mrf.mxu1 }
0x16a6   :  { %v1109_v57 = vmax.f32 %v2025_v2, 0.0 }
0x16a7   :  { %1781 = dma.done.wait [#allocation3], 8192 }
0x16a8   :  { %1782 = vsyncadd [#allocation3], 4294959104  ;;  %1264 = vmatprep.mubr.f32.mxu0 %v1791_v0  ;;  %1335 = vmatprep.mubr.f32.mxu1 %v1791_v0  ;;  %v1175_v4 = vld [vmem:[#allocation2 + $0x1e8] sm:$0xff]  ;;  %v1177_v58 = vld [vmem:[#allocation2 + $0x1f8] sm:$0xff]  ;;  %s1797_s11 = smov [#allocation12]  }
0x16a9   :  { %v1174_v59 = vld [vmem:[#allocation2 + $0x1e0] sm:$0xff]  ;;  %1200 = vmatprep.subr.mxu0 %v1175_v4  ;;  %1271 = vmatprep.subr.mxu1 %v1177_v58  ;;  %v1176_v6 = vld [vmem:[#allocation2 + $0x1f0] sm:$0xff]  ;;  %v1171_v60 = vld [vmem:[#allocation2 + $0x1c8] sm:$0xff] }
0x16aa   :  { %v1173_v8 = vld [vmem:[#allocation2 + $0x1d8] sm:$0xff]  ;;  %1201 = vmatpush1.msra.mxu0 %v1174_v59  ;;  %1272 = vmatpush1.msra.mxu1 %v1176_v6  ;;  %v1170_v61 = vld [vmem:[#allocation2 + $0x1c0] sm:$0xff]  ;;  %v1172_v62 = vld [vmem:[#allocation2 + $0x1d0] sm:$0xff]  ;;  %v1180_v59 = vlaneseq }
0x16ab   :  { %v1167_v63 = vld [vmem:[#allocation2 + $0x1a8] sm:$0xff]  ;;  %1202 = vmatprep.subr.mxu0 %v1171_v60  ;;  %1273 = vmatprep.subr.mxu1 %v1173_v8  ;;  %v1169_v1 = vld [vmem:[#allocation2 + $0x1b8] sm:$0xff]  ;;  %v1166_v3 = vld [vmem:[#allocation2 + $0x1a0] sm:$0xff]  ;;  %v1796_v60 = vmov 1966171168  }
0x16ac   :  { %v1168_v5 = vld [vmem:[#allocation2 + $0x1b0] sm:$0xff]  ;;  %1203 = vmatpush1.msra.mxu0 %v1170_v61  ;;  %1274 = vmatpush1.msra.mxu1 %v1172_v62  ;;  %v1163_v0 = vld [vmem:[#allocation2 + $0x188] sm:$0xff]  ;;  %v1165_v7 = vld [vmem:[#allocation2 + $0x198] sm:$0xff]  ;;  %v1181_v6 = vshrl.u32 %v1180_v59, 7  ;;  %v1349_v8 = vunpack.c.l.s4 %v1796_v60  ;;  %vm1373_vm2 = vcmp.lt.s32.totalorder %v1180_v59, 512 }
0x16ad   :  { %1204 = vmatprep.subr.mxu0 %v1167_v63  ;;  %1275 = vmatprep.subr.mxu1 %v1169_v1  ;;  %v1162_v9 = vld [vmem:[#allocation2 + $0x180] sm:$0xff]  ;;  %v1164_v10 = vld [vmem:[#allocation2 + $0x190] sm:$0xff]  ;;  %v1159_v11 = vld [vmem:[#allocation2 + $0x168] sm:$0xff] }
0x16ae   :  { %1205 = vmatpush1.msra.mxu0 %v1166_v3  ;;  %1276 = vmatpush1.msra.mxu1 %v1168_v5  ;;  %v1161_v12 = vld [vmem:[#allocation2 + $0x178] sm:$0xff]  ;;  %v1158_v14 = vld [vmem:[#allocation2 + $0x160] sm:$0xff]  ;;  %v1160_v15 = vld [vmem:[#allocation2 + $0x170] sm:$0xff]  ;;  %v1182_v61 = vsub.s32 0, %v1181_v6  ;;  %v1190_v62 = vsub.s32 2, %v1181_v6  ;;  %v1186_v63 = vsub.s32 1, %v1181_v6  ;;  %v1350_v5 = vunpack.c.0.s8 %v1349_v8 }
0x16af   :  { %1206 = vmatprep.subr.mxu0 %v1163_v0  ;;  %1277 = vmatprep.subr.mxu1 %v1165_v7  ;;  %v1155_v16 = vld [vmem:[#allocation2 + $0x148] sm:$0xff]  ;;  %v1157_v17 = vld [vmem:[#allocation2 + $0x158] sm:$0xff]  ;;  %v1154_v18 = vld [vmem:[#allocation2 + $0x140] sm:$0xff]  ;;  %v1194_v1 = vsub.s32 3, %v1181_v6 }
0x16b0   :  { %1207 = vmatpush1.msra.mxu0 %v1162_v9  ;;  %1278 = vmatpush1.msra.mxu1 %v1164_v10  ;;  %v1156_v19 = vld [vmem:[#allocation2 + $0x150] sm:$0xff]  ;;  %v1151_v20 = vld [vmem:[#allocation2 + $0x128] sm:$0xff]  ;;  %v1153_v21 = vld [vmem:[#allocation2 + $0x138] sm:$0xff] }
0x16b1   :  { %1208 = vmatprep.subr.mxu0 %v1159_v11  ;;  %1279 = vmatprep.subr.mxu1 %v1161_v12  ;;  %v1150_v22 = vld [vmem:[#allocation2 + $0x120] sm:$0xff]  ;;  %v1152_v23 = vld [vmem:[#allocation2 + $0x130] sm:$0xff]  ;;  %v1147_v24 = vld [vmem:[#allocation2 + $0x108] sm:$0xff]  ;;  %v1353_v12 = vsub.s32 %v1350_v5, %v1181_v6 }
0x16b2   :  { %1209 = vmatpush1.msra.mxu0 %v1158_v14  ;;  %1280 = vmatpush1.msra.mxu1 %v1160_v15  ;;  %v1149_v25 = vld [vmem:[#allocation2 + $0x118] sm:$0xff]  ;;  %v1146_v26 = vld [vmem:[#allocation2 + $0x100] sm:$0xff]  ;;  %v1148_v27 = vld [vmem:[#allocation2 + $0x110] sm:$0xff] }
0x16b3   :  { %1210 = vmatprep.subr.mxu0 %v1155_v16  ;;  %1281 = vmatprep.subr.mxu1 %v1157_v17  ;;  %v1143_v28 = vld [vmem:[#allocation2 + $0xe8] sm:$0xff]  ;;  %v1145_v29 = vld [vmem:[#allocation2 + $0xf8] sm:$0xff]  ;;  %v1142_v30 = vld [vmem:[#allocation2 + $0xe0] sm:$0xff] }
0x16b4   :  { %1211 = vmatpush1.msra.mxu0 %v1154_v18  ;;  %1282 = vmatpush1.msra.mxu1 %v1156_v19  ;;  %v1144_v31 = vld [vmem:[#allocation2 + $0xf0] sm:$0xff]  ;;  %v1139_v32 = vld [vmem:[#allocation2 + $0xc8] sm:$0xff]  ;;  %v1141_v33 = vld [vmem:[#allocation2 + $0xd8] sm:$0xff] }
0x16b5   :  { %1212 = vmatprep.subr.mxu0 %v1151_v20  ;;  %1283 = vmatprep.subr.mxu1 %v1153_v21  ;;  %v1138_v34 = vld [vmem:[#allocation2 + $0xc0] sm:$0xff]  ;;  %v1140_v35 = vld [vmem:[#allocation2 + $0xd0] sm:$0xff]  ;;  %v1135_v36 = vld [vmem:[#allocation2 + $0xa8] sm:$0xff] }
0x16b6   :  { %1213 = vmatpush1.msra.mxu0 %v1150_v22  ;;  %1284 = vmatpush1.msra.mxu1 %v1152_v23  ;;  %v1137_v37 = vld [vmem:[#allocation2 + $0xb8] sm:$0xff]  ;;  %v1134_v38 = vld [vmem:[#allocation2 + $0xa0] sm:$0xff]  ;;  %v1136_v39 = vld [vmem:[#allocation2 + $0xb0] sm:$0xff] }
0x16b7   :  { %1214 = vmatprep.subr.mxu0 %v1147_v24  ;;  %1285 = vmatprep.subr.mxu1 %v1149_v25  ;;  %v1131_v40 = vld [vmem:[#allocation2 + $0x88] sm:$0xff]  ;;  %v1133_v41 = vld [vmem:[#allocation2 + $0x98] sm:$0xff]  ;;  %v1130_v42 = vld [vmem:[#allocation2 + $0x80] sm:$0xff] }
0x16b8   :  { %1215 = vmatpush1.msra.mxu0 %v1146_v26  ;;  %1286 = vmatpush1.msra.mxu1 %v1148_v27  ;;  %v1132_v43 = vld [vmem:[#allocation2 + $0x90] sm:$0xff]  ;;  %v1127_v44 = vld [vmem:[#allocation2 + $0x68] sm:$0xff]  ;;  %v1129_v45 = vld [vmem:[#allocation2 + $0x78] sm:$0xff] }
0x16b9   :  { %1216 = vmatprep.subr.mxu0 %v1143_v28  ;;  %1287 = vmatprep.subr.mxu1 %v1145_v29  ;;  %v1126_v13 = vld [vmem:[#allocation2 + $0x60] sm:$0xff]  ;;  %v1128_v46 = vld [vmem:[#allocation2 + $0x70] sm:$0xff]  ;;  %v1123_v47 = vld [vmem:[#allocation2 + $0x48] sm:$0xff] }
0x16ba   :  { %1217 = vmatpush1.msra.mxu0 %v1142_v30  ;;  %1288 = vmatpush1.msra.mxu1 %v1144_v31  ;;  %v1125_v48 = vld [vmem:[#allocation2 + $0x58] sm:$0xff]  ;;  %v1122_v49 = vld [vmem:[#allocation2 + $0x40] sm:$0xff]  ;;  %v1124_v50 = vld [vmem:[#allocation2 + $0x50] sm:$0xff] }
0x16bb   :  { %1218 = vmatprep.subr.mxu0 %v1139_v32  ;;  %1289 = vmatprep.subr.mxu1 %v1141_v33  ;;  %v1119_v51 = vld [vmem:[#allocation2 + $0x28] sm:$0xff]  ;;  %v1121_v52 = vld [vmem:[#allocation2 + $0x38] sm:$0xff]  ;;  %v1118_v53 = vld [vmem:[#allocation2 + $0x20] sm:$0xff] }
0x16bc   :  { %1219 = vmatpush1.msra.mxu0 %v1138_v34  ;;  %1290 = vmatpush1.msra.mxu1 %v1140_v35  ;;  %v1120_v54 = vld [vmem:[#allocation2 + $0x30] sm:$0xff]  ;;  %v1115_v55 = vld [vmem:[#allocation2 + $0x8] sm:$0xff]  ;;  %v1117_v56 = vld [vmem:[#allocation2 + $0x18] sm:$0xff] }
0x16bd   :  { %1220 = vmatprep.subr.mxu0 %v1135_v36  ;;  %1291 = vmatprep.subr.mxu1 %v1137_v37  ;;  %v1114_v4 = vld [vmem:[#allocation2] sm:$0xff]  ;;  %v1116_v58 = vld [vmem:[#allocation2 + $0x10] sm:$0xff] }
0x16be   :  { %1221 = vmatpush1.msra.mxu0 %v1134_v38  ;;  %1292 = vmatpush1.msra.mxu1 %v1136_v39  ;;  %v1178_v3 = vld [vmem:[%s2047_s7] sm:$0xf]  ;;  %s1382_s7 = sshll.u32 %s1797_s11, 4  ;;  %s1383_s7 = int_to_ptr.vmem [resolvable:$true] %s1382_s7 }
0x16bf   :  { %1222 = vmatprep.subr.mxu0 %v1131_v40  ;;  %1293 = vmatprep.subr.mxu1 %v1133_v41  ;;  %v1183_v0 = vrot.slane %v1178_v3, %v1182_v61  ;;  %v1191_v7 = vrot.slane %v1178_v3, %v1190_v62  ;;  %v1187_v9 = vrot.slane %v1178_v3, %v1186_v63  ;;  %s1755_s12 = scalar_lea.vmem %s1383_s7, 64  ;;  %p1760_p12 = scmp.lt.s32.totalorder %s1383_s7, %s1383_s7 }
0x16c0   :  { %1223 = vmatpush1.msra.mxu0 %v1130_v42  ;;  %1294 = vmatpush1.msra.mxu1 %v1132_v43  ;;  %v1195_v10 = vrot.slane %v1178_v3, %v1194_v1  ;;  %p1756_p11 = scmp.ne.s32.totalorder %s1383_s7, %s1755_s12  ;;  %p1761_p13 = scmp.lt.s32.totalorder %s1755_s12, %s1755_s12 }
0x16c1   :  { %1224 = vmatprep.subr.mxu0 %v1127_v44  ;;  %1295 = vmatprep.subr.mxu1 %v1129_v45 }
0x16c2   :  { %1225 = vmatpush1.msra.mxu0 %v1126_v13  ;;  %1296 = vmatpush1.msra.mxu1 %v1128_v46  ;;  %p1762_p0 = por %p1761_p13, %p1760_p12 }
0x16c3   :  { %1226 = vmatprep.subr.mxu0 %v1123_v47  ;;  %1297 = vmatprep.subr.mxu1 %v1125_v48 }
0x16c4   :  { %1227 = vmatpush1.msra.mxu0 %v1122_v49  ;;  %1298 = vmatpush1.msra.mxu1 %v1124_v50  ;;  %p1763_p1 = pnand %p1762_p0, %p1756_p11 }
0x16c5   :  { %1228 = vmatprep.subr.mxu0 %v1119_v51  ;;  %1299 = vmatprep.subr.mxu1 %v1121_v52 }
0x16c6   :  { %1229 = vmatpush1.msra.mxu0 %v1118_v53  ;;  %1300 = vmatpush1.msra.mxu1 %v1120_v54 }
0x16c7   :  { %1230 = vmatprep.subr.mxu0 %v1115_v55  ;;  %1301 = vmatprep.subr.mxu1 %v1117_v56 }
0x16c8   :  { %1231 = vmatpush1.msra.mxu0 %v1114_v4  ;;  %1302 = vmatpush1.msra.mxu1 %v1116_v58 }
0x16c9   :  { %1265 = vmatmul.mubr.f32.vlgmr.msra.gmra.mxu0 %v1109_v57  ;;  %1336 = vmatmul.mubr.f32.vlgmr.msra.gmra.mxu1 %v1109_v57 }
0x1789   :  { %v1266_v11 = vpop.f32.mrf.mxu0  ;;  %v1337_v2 = vpop.f32.mrf.mxu1 }
0x178a   :  { %v1267_v15 = vadd.f32 %v1266_v11, %v1183_v0  ;;  %v1338_v16 = vadd.f32 %v1337_v2, %v1191_v7 }
0x178b   :  { %v1268_v57 = vpop.f32.mrf.mxu0  ;;  %v1339_v14 = vpop.f32.mrf.mxu1 }
0x178c   :  { %v1269_v17 = vadd.f32 %v1268_v57, %v1187_v9  ;;  %v1340_v18 = vadd.f32 %v1339_v14, %v1195_v10 }
0x178e   :  { %v1346_v19 = vcombine.low %v1267_v15, %v1269_v17  ;;  %v1347_v20 = vcombine.low %v1338_v16, %v1340_v18 }
0x1790   :  { %v1354_v21 = vrot.slane %v1346_v19, %v1353_v12  ;;  %v1361_v22 = vrot.slane %v1347_v20, %v1353_v12 }
0x1792   :  { %v1362_v23 = vcombine.low %v1354_v21, %v1361_v22 }
0x1794   :  { %v1369_v24 = vrot.slane %v1362_v23, %v1353_v12 }
0x1796   :  { %1375 = vst.msk [vmem:[#allocation12] sm:$0xf] %vm1373_vm2, %v1369_v24 }
0x1797   :  { %1766 = shalt.err (!%p1763_p1)
}
0x1798   :  { %1385 = dma.vmem_to_hbm [thread:$0]  %s1383_s7, 64, %s2048_s8, [#allocation6]  }
0x1799   :  { %1783 = dma.done.wait [#allocation6], 64  }
0x179a   :  { %1784 = vsyncadd [#allocation6], 4294967232 }
0x179b   :  { %1389 = vsyncpa [#allocation5], 1 }
0x179c   :  { %1390 = vsyncpa [#allocation8], 1 }
0x179d   :  { %1391 = vsyncpa [#allocation11], 1 }
0x179e   :  { %1392 = vsyncpa [#allocation6], 1 }
0x179f   :  { %1393 = vsyncmov [#allocation3] }
0x17a2   :  { %s1394_s15 = vpop.sfrf %1393 }
0x17a3   :  { %p1417_p2 = scmp.ne.s32.totalorder %s1394_s15, 0 }
0x17a5   :  { %1398 = shalt.err (%p1417_p2)  }

</bundles_post_ra>
